<compile_context>
chip_gen: v7x
topology: tpu7x:2x2x1
jax: 0.10.0
libtpu: 0.0.40
codegen_flags: <defaults>
</compile_context>

<pallas_src>
import functools

import jax
import jax.numpy as jnp
from jax.experimental import pallas as pl
from jax.experimental.pallas import tpu as pltpu

_LANE = 128      # lane width (last dim alignment)
_SUBLANE = 8     # f32 sublane count (second-to-last dim alignment)


def _round_up(x, m):
    return (x + m - 1) // m * m


def _pad2d(a, rows, cols):
    return jnp.pad(a, ((0, rows - a.shape[0]), (0, cols - a.shape[1])))


def _encoder_kernel(x_ref, w1_ref, b1_ref, w2_ref, b2_ref, w3_ref, b3_ref,
                    z_ref):
    """Fused 3x (matmul + bias + ReLU) on one batch tile."""
    cdt = w1_ref.dtype  # matmul input dtype (bf16); accumulate in f32.

    # linear1 + ReLU (bias add / ReLU on the f32 accumulator).
    h1 = jnp.dot(x_ref[...], w1_ref[...], preferred_element_type=jnp.float32)
    h1 = jnp.maximum(h1 + b1_ref[...], 0.0)
    # linear2 + ReLU
    h2 = jnp.dot(h1.astype(cdt), w2_ref[...],
                 preferred_element_type=jnp.float32)
    h2 = jnp.maximum(h2 + b2_ref[...], 0.0)
    # linear3 + ReLU
    h3 = jnp.dot(h2.astype(cdt), w3_ref[...],
                 preferred_element_type=jnp.float32)
    z_ref[...] = jnp.maximum(h3 + b3_ref[...], 0.0).astype(z_ref.dtype)


@functools.partial(jax.jit, static_argnames=("tile_b",))
def encoder_forward(x, params, *, tile_b=256):
    """x: [B, in_size] float32. params: dict of (w1,b1,w2,b2,w3,b3)."""
    w1, b1 = params["w1"], params["b1"]
    w2, b2 = params["w2"], params["b2"]
    w3, b3 = params["w3"], params["b3"]

    B, in_size = x.shape
    h1, h2, latent = w1.shape[1], w2.shape[1], w3.shape[1]

    # Lane-dense (multiple-of-128) feature dims.
    in_p = _round_up(in_size, _LANE)
    h1_p = _round_up(h1, _LANE)
    h2_p = _round_up(h2, _LANE)
    lat_p = _round_up(latent, _LANE)

    # Batch tile: multiple of 8 sublanes, capped at tile_b; pad B to a multiple.
    tb = min(tile_b, _round_up(B, _SUBLANE))
    b_p = _round_up(B, tb)
    grid = (b_p // tb,)

    mm_dtype = jnp.bfloat16  # MXU inputs; accumulation stays f32.

    x_p = _pad2d(x, b_p, in_p).astype(mm_dtype)
    w1_p = _pad2d(w1, in_p, h1_p).astype(mm_dtype)
    w2_p = _pad2d(w2, h1_p, h2_p).astype(mm_dtype)
    w3_p = _pad2d(w3, h2_p, lat_p).astype(mm_dtype)
    b1_p = _pad2d(b1, 1, h1_p).astype(jnp.float32)
    b2_p = _pad2d(b2, 1, h2_p).astype(jnp.float32)
    b3_p = _pad2d(b3, 1, lat_p).astype(jnp.float32)

    flops = 2 * b_p * (in_p * h1_p + h1_p * h2_p + h2_p * lat_p)
    bytes_accessed = (
        x_p.size * x_p.dtype.itemsize
        + w1_p.size * w1_p.dtype.itemsize + w2_p.size * w2_p.dtype.itemsize
        + w3_p.size * w3_p.dtype.itemsize
        + (b1_p.size + b2_p.size + b3_p.size) * 4
        + b_p * lat_p * 4)

    out = pl.pallas_call(
        _encoder_kernel,
        out_shape=jax.ShapeDtypeStruct((b_p, lat_p), jnp.float32),
        grid=grid,
        in_specs=[
            # Activation stream: tiled over batch, pipelined/double-buffered.
            pl.BlockSpec((tb, in_p), lambda i: (i, 0)),
            # Weights / biases: constant index_map -> VMEM-resident across steps.
            pl.BlockSpec((in_p, h1_p), lambda i: (0, 0)),
            pl.BlockSpec((1, h1_p), lambda i: (0, 0)),
            pl.BlockSpec((h1_p, h2_p), lambda i: (0, 0)),
            pl.BlockSpec((1, h2_p), lambda i: (0, 0)),
            pl.BlockSpec((h2_p, lat_p), lambda i: (0, 0)),
            pl.BlockSpec((1, lat_p), lambda i: (0, 0)),
        ],
        out_specs=pl.BlockSpec((tb, lat_p), lambda i: (i, 0)),
        compiler_params=pltpu.CompilerParams(
            dimension_semantics=("parallel",)),
        cost_estimate=pl.CostEstimate(
            flops=flops, transcendentals=0, bytes_accessed=bytes_accessed),
    )(x_p, w1_p, b1_p, w2_p, b2_p, w3_p, b3_p)

    # Drop batch / lane padding.
    return out[:B, :latent]


def init_encoder_params(key, in_size, latent_size):
    """Deterministic synthetic parameters matching nn.Linear shapes.

    PyTorch stores Linear weight as [out, in]; we keep the transposed [in, out]
    layout for direct matmul in the kernel.
    """
    h1 = in_size // 2
    h2 = in_size // 4
    k1, k2, k3, k4, k5, k6 = jax.random.split(key, 6)
    scale = 0.1
    return {
        "w1": scale * jax.random.normal(k1, (in_size, h1), jnp.float32),
        "b1": scale * jax.random.normal(k2, (1, h1), jnp.float32),
        "w2": scale * jax.random.normal(k3, (h1, h2), jnp.float32),
        "b2": scale * jax.random.normal(k4, (1, h2), jnp.float32),
        "w3": scale * jax.random.normal(k5, (h2, latent_size), jnp.float32),
        "b3": scale * jax.random.normal(k6, (1, latent_size), jnp.float32),
    }


def encoder_reference(x, p, mm_dtype=jnp.bfloat16):
    """Pure-JAX reference mirroring the kernel's bf16-in / f32-accumulate path."""
    def lin(a, w, b):
        acc = jnp.dot(a.astype(mm_dtype), w.astype(mm_dtype),
                      preferred_element_type=jnp.float32)
        return jnp.maximum(acc + b, 0.0)
    h = lin(x, p["w1"], p["b1"])
    h = lin(h, p["w2"], p["b2"])
    return lin(h, p["w3"], p["b3"])


def encoder_reference_f32(x, p):
    """Full-f32 reference matching the original PyTorch forward semantics."""
    h = jnp.maximum(x @ p["w1"] + p["b1"], 0.0)
    h = jnp.maximum(h @ p["w2"] + p["b2"], 0.0)
    return jnp.maximum(h @ p["w3"] + p["b3"], 0.0)


if __name__ == "__main__":
    key = jax.random.PRNGKey(0)
    in_size = 32          # in_size/2 = 16, in_size/4 = 8
    latent_size = 8
    batch = 4

    kx, kp = jax.random.split(key)
    x = jax.random.normal(kx, (batch, in_size), jnp.float32)
    params = init_encoder_params(kp, in_size, latent_size)

    z = encoder_forward(x, params)
    z = jax.block_until_ready(z)
    assert z.shape == (batch, latent_size)

    # Tight check against a reference using the same bf16-in/f32-acc matmuls.
    z_ref = encoder_reference(x, params)
    assert jnp.allclose(z, z_ref, atol=1e-3, rtol=1e-3), "mismatch vs bf16 reference"

    # Loose sanity check against the pure-f32 PyTorch-equivalent forward.
    z_f32 = encoder_reference_f32(x, params)
    assert jnp.allclose(z, z_f32, atol=2e-2, rtol=2e-2), "mismatch vs f32 reference"

    print("KERNEL_OK")
</pallas_src>

<mosaic_0001>
module attributes {stable_mosaic.version = 11 : i64} {
  func.func @_encoder_kernel(%arg0: i32, %arg1: memref<8x128xbf16, #tpu.memory_space<vmem>>, %arg2: memref<128x128xbf16, #tpu.memory_space<vmem>>, %arg3: memref<1x128xf32, #tpu.memory_space<vmem>>, %arg4: memref<128x128xbf16, #tpu.memory_space<vmem>>, %arg5: memref<1x128xf32, #tpu.memory_space<vmem>>, %arg6: memref<128x128xbf16, #tpu.memory_space<vmem>>, %arg7: memref<1x128xf32, #tpu.memory_space<vmem>>, %arg8: memref<8x128xf32, #tpu.memory_space<vmem>>) attributes {dimension_semantics = [#tpu.dimension_semantics<parallel>], iteration_bounds = array<i64: 1>, scalar_prefetch = 0 : i64, scratch_operands = 0 : i64, tpu.core_type = #tpu.core_type<tc>, window_params = [{transform_indices = @transform_0, window_bounds = array<i64: 8, 128>}, {pipeline_mode = #tpu.pipeline_mode<synchronous>, transform_indices = @transform_1, window_bounds = array<i64: 128, 128>}, {pipeline_mode = #tpu.pipeline_mode<synchronous>, transform_indices = @transform_2, window_bounds = array<i64: 1, 128>}, {pipeline_mode = #tpu.pipeline_mode<synchronous>, transform_indices = @transform_3, window_bounds = array<i64: 128, 128>}, {pipeline_mode = #tpu.pipeline_mode<synchronous>, transform_indices = @transform_4, window_bounds = array<i64: 1, 128>}, {pipeline_mode = #tpu.pipeline_mode<synchronous>, transform_indices = @transform_5, window_bounds = array<i64: 128, 128>}, {pipeline_mode = #tpu.pipeline_mode<synchronous>, transform_indices = @transform_6, window_bounds = array<i64: 1, 128>}, {transform_indices = @transform_7, window_bounds = array<i64: 8, 128>}]} {
    %c0 = arith.constant 0 : index
    %c0_0 = arith.constant 0 : index
    %0 = vector.load %arg1[%c0, %c0_0] : memref<8x128xbf16, #tpu.memory_space<vmem>>, vector<8x128xbf16>
    %c0_1 = arith.constant 0 : index
    %c0_2 = arith.constant 0 : index
    %1 = vector.load %arg2[%c0_1, %c0_2] : memref<128x128xbf16, #tpu.memory_space<vmem>>, vector<128x128xbf16>
    %cst = arith.constant dense<0.000000e+00> : vector<8x128xf32>
    %2 = tpu.matmul %0, %1, %cst {dimension_numbers = #tpu.dot_dimension_numbers<[1], [0], [0], [1], [0, 0, 1, 1], [], []>} : vector<8x128xbf16>, vector<128x128xbf16>, vector<8x128xf32> -> vector<8x128xf32>
    %c0_3 = arith.constant 0 : index
    %c0_4 = arith.constant 0 : index
    %3 = vector.load %arg3[%c0_3, %c0_4] : memref<1x128xf32, #tpu.memory_space<vmem>>, vector<1x128xf32>
    %4 = vector.broadcast %3 : vector<1x128xf32> to vector<8x128xf32>
    %5 = arith.addf %2, %4 : vector<8x128xf32>
    %cst_5 = arith.constant 0.000000e+00 : f32
    %6 = vector.broadcast %cst_5 : f32 to vector<8x128xf32>
    %7 = arith.maximumf %5, %6 : vector<8x128xf32>
    %8 = arith.truncf %7 : vector<8x128xf32> to vector<8x128xbf16>
    %c0_6 = arith.constant 0 : index
    %c0_7 = arith.constant 0 : index
    %9 = vector.load %arg4[%c0_6, %c0_7] : memref<128x128xbf16, #tpu.memory_space<vmem>>, vector<128x128xbf16>
    %cst_8 = arith.constant dense<0.000000e+00> : vector<8x128xf32>
    %10 = tpu.matmul %8, %9, %cst_8 {dimension_numbers = #tpu.dot_dimension_numbers<[1], [0], [0], [1], [0, 0, 1, 1], [], []>} : vector<8x128xbf16>, vector<128x128xbf16>, vector<8x128xf32> -> vector<8x128xf32>
    %c0_9 = arith.constant 0 : index
    %c0_10 = arith.constant 0 : index
    %11 = vector.load %arg5[%c0_9, %c0_10] : memref<1x128xf32, #tpu.memory_space<vmem>>, vector<1x128xf32>
    %12 = vector.broadcast %11 : vector<1x128xf32> to vector<8x128xf32>
    %13 = arith.addf %10, %12 : vector<8x128xf32>
    %cst_11 = arith.constant 0.000000e+00 : f32
    %14 = vector.broadcast %cst_11 : f32 to vector<8x128xf32>
    %15 = arith.maximumf %13, %14 : vector<8x128xf32>
    %16 = arith.truncf %15 : vector<8x128xf32> to vector<8x128xbf16>
    %c0_12 = arith.constant 0 : index
    %c0_13 = arith.constant 0 : index
    %17 = vector.load %arg6[%c0_12, %c0_13] : memref<128x128xbf16, #tpu.memory_space<vmem>>, vector<128x128xbf16>
    %cst_14 = arith.constant dense<0.000000e+00> : vector<8x128xf32>
    %18 = tpu.matmul %16, %17, %cst_14 {dimension_numbers = #tpu.dot_dimension_numbers<[1], [0], [0], [1], [0, 0, 1, 1], [], []>} : vector<8x128xbf16>, vector<128x128xbf16>, vector<8x128xf32> -> vector<8x128xf32>
    %c0_15 = arith.constant 0 : index
    %c0_16 = arith.constant 0 : index
    %19 = vector.load %arg7[%c0_15, %c0_16] : memref<1x128xf32, #tpu.memory_space<vmem>>, vector<1x128xf32>
    %20 = vector.broadcast %19 : vector<1x128xf32> to vector<8x128xf32>
    %21 = arith.addf %18, %20 : vector<8x128xf32>
    %cst_17 = arith.constant 0.000000e+00 : f32
    %22 = vector.broadcast %cst_17 : f32 to vector<8x128xf32>
    %23 = arith.maximumf %21, %22 : vector<8x128xf32>
    %c0_18 = arith.constant 0 : index
    %c0_19 = arith.constant 0 : index
    %24 = vector.load %arg8[%c0_18, %c0_19] : memref<8x128xf32, #tpu.memory_space<vmem>>, vector<8x128xf32>
    tpu.vector_store %arg8[%c0_18, %c0_19], %23 {strides = array<i32>} : memref<8x128xf32, #tpu.memory_space<vmem>>, vector<8x128xf32>,
    return
  }
  func.func @transform_0(%arg0: i32) -> (i32, i32) {
    %c0_i32 = arith.constant 0 : i32
    %c0_i32_0 = arith.constant 0 : i32
    return %arg0, %c0_i32 : i32, i32
  }
  func.func @transform_1(%arg0: i32) -> (i32, i32) {
    %c0_i32 = arith.constant 0 : i32
    %c0_i32_0 = arith.constant 0 : i32
    %c0_i32_1 = arith.constant 0 : i32
    return %c0_i32, %c0_i32_0 : i32, i32
  }
  func.func @transform_2(%arg0: i32) -> (i32, i32) {
    %c0_i32 = arith.constant 0 : i32
    %c0_i32_0 = arith.constant 0 : i32
    %c0_i32_1 = arith.constant 0 : i32
    return %c0_i32, %c0_i32_0 : i32, i32
  }
  func.func @transform_3(%arg0: i32) -> (i32, i32) {
    %c0_i32 = arith.constant 0 : i32
    %c0_i32_0 = arith.constant 0 : i32
    %c0_i32_1 = arith.constant 0 : i32
    return %c0_i32, %c0_i32_0 : i32, i32
  }
  func.func @transform_4(%arg0: i32) -> (i32, i32) {
    %c0_i32 = arith.constant 0 : i32
    %c0_i32_0 = arith.constant 0 : i32
    %c0_i32_1 = arith.constant 0 : i32
    return %c0_i32, %c0_i32_0 : i32, i32
  }
  func.func @transform_5(%arg0: i32) -> (i32, i32) {
    %c0_i32 = arith.constant 0 : i32
    %c0_i32_0 = arith.constant 0 : i32
    %c0_i32_1 = arith.constant 0 : i32
    return %c0_i32, %c0_i32_0 : i32, i32
  }
  func.func @transform_6(%arg0: i32) -> (i32, i32) {
    %c0_i32 = arith.constant 0 : i32
    %c0_i32_0 = arith.constant 0 : i32
    %c0_i32_1 = arith.constant 0 : i32
    return %c0_i32, %c0_i32_0 : i32, i32
  }
  func.func @transform_7(%arg0: i32) -> (i32, i32) {
    %c0_i32 = arith.constant 0 : i32
    %c0_i32_0 = arith.constant 0 : i32
    return %arg0, %c0_i32 : i32, i32
  }
}

</mosaic_0001>

<bundles_post_ra>
// kernel: encoder_forward.1
= control target key start
LH: loop header
LB: loop body
LE: loop exit
PB: predicated region body
PF: predicated region fallthrough
CT: control target
= control target key end

     0   :  { %v511_v0 = vmov 0.0   ;;  %vm512_vm0 = vmmov 0   ;;  %s670_s1 = inlined_call_operand.vmem [shape: bf16[128,128], index: 1, kind: input, shape index: {}]   ;;  %s671_s3 = inlined_call_operand.vmem [shape: bf16[128,128], index: 3, kind: input, shape index: {}]   ;;  %s672_s0 = inlined_call_operand.vmem [shape: bf16[8,128], index: 0, kind: input, shape index: {}]   ;;  %s673_s5 = inlined_call_operand.vmem [shape: bf16[128,128], index: 5, kind: input, shape index: {}]   ;;  %s674_s2 = inlined_call_operand.vmem [shape: f32[1,128], index: 2, kind: input, shape index: {}]   ;;  %s675_s4 = inlined_call_operand.vmem [shape: f32[1,128], index: 4, kind: input, shape index: {}]   ;;  %s676_s6 = inlined_call_operand.vmem [shape: f32[1,128], index: 6, kind: input, shape index: {}]   ;;  %s677_s7 = inlined_call_operand.vmem [shape: f32[8,128], index: 7, kind: output, shape index: {}]  }
   0x1   :  { %425 = vmatprep.subr.bf16.mxu0 %v511_v0  ;;  %v487_v1 = vld [vmem:[%s670_s1] sm:$0xff]   ;;  %441 = vmatprep.mubr.msk.bf16.mxu0 %vm512_vm0, %v511_v0  ;;  %v488_v2 = vld [vmem:[%s670_s1 + $0x8] sm:$0xff]   ;;  %v489_v3 = vld [vmem:[%s670_s1 + $0x10] sm:$0xff]  }
   0x2   :  { %445 = vmatprep.subr.bf16.mxu1 %v511_v0  ;;  %461 = vmatprep.mubr.msk.bf16.mxu1 %vm512_vm0, %v511_v0  ;;  %v495_v4 = vld [vmem:[%s671_s3] sm:$0xff]   ;;  %v490_v5 = vld [vmem:[%s670_s1 + $0x18] sm:$0xff]   ;;  %v496_v6 = vld [vmem:[%s671_s3 + $0x8] sm:$0xff]  }
   0x3   :  { %426 = vmatpush3.bf16.msra.mxu0 %v487_v1  ;;  %446 = vmatpush3.bf16.msra.mxu1 %v495_v4  ;;  %v491_v7 = vld [vmem:[%s670_s1 + $0x20] sm:$0xff]   ;;  %v497_v8 = vld [vmem:[%s671_s3 + $0x10] sm:$0xff]   ;;  %v492_v9 = vld [vmem:[%s670_s1 + $0x28] sm:$0xff]  }
   0x4   :  { %427 = vmatprep.subr.bf16.mxu0 %v511_v0  ;;  %447 = vmatprep.subr.bf16.mxu1 %v511_v0  ;;  %v498_v10 = vld [vmem:[%s671_s3 + $0x18] sm:$0xff]   ;;  %v493_v11 = vld [vmem:[%s670_s1 + $0x30] sm:$0xff]   ;;  %v499_v12 = vld [vmem:[%s671_s3 + $0x20] sm:$0xff]  }
   0x5   :  { %v494_v13 = vld [vmem:[%s670_s1 + $0x38] sm:$0xff]   ;;  %v500_v14 = vld [vmem:[%s671_s3 + $0x28] sm:$0xff]   ;;  %v27_v15 = vld [vmem:[%s672_s0] sm:$0xf] }
   0x6   :  { %v501_v16 = vld [vmem:[%s671_s3 + $0x30] sm:$0xff]   ;;  %v502_v17 = vld [vmem:[%s671_s3 + $0x38] sm:$0xff]   ;;  %v503_v18 = vld [vmem:[%s673_s5] sm:$0xff]  }
   0x7   :  { %428 = vmatpush3.bf16.msra.mxu0 %v488_v2  ;;  %448 = vmatpush3.bf16.msra.mxu1 %v496_v6  ;;  %v504_v19 = vld [vmem:[%s673_s5 + $0x8] sm:$0xff]   ;;  %v505_v20 = vld [vmem:[%s673_s5 + $0x10] sm:$0xff]   ;;  %v506_v21 = vld [vmem:[%s673_s5 + $0x18] sm:$0xff]  }
   0x8   :  { %429 = vmatprep.subr.bf16.mxu0 %v511_v0  ;;  %449 = vmatprep.subr.bf16.mxu1 %v511_v0  ;;  %v507_v22 = vld [vmem:[%s673_s5 + $0x20] sm:$0xff]   ;;  %v508_v23 = vld [vmem:[%s673_s5 + $0x28] sm:$0xff]   ;;  %v509_v32 = vld [vmem:[%s673_s5 + $0x30] sm:$0xff]  }
   0x9   :  { %v371_v24 = vld [vmem:[%s674_s2] ss:$0 sm:$0xff]  ;;  %v510_v33 = vld [vmem:[%s673_s5 + $0x38] sm:$0xff]  }
   0xa   :  { %v380_v34 = vld [vmem:[%s675_s4] ss:$0 sm:$0xff] }
   0xb   :  { %430 = vmatpush3.bf16.msra.mxu0 %v489_v3  ;;  %450 = vmatpush3.bf16.msra.mxu1 %v497_v8  ;;  %v389_v42 = vld [vmem:[%s676_s6] ss:$0 sm:$0xff] }
   0xc   :  { %431 = vmatprep.subr.bf16.mxu0 %v511_v0  ;;  %451 = vmatprep.subr.bf16.mxu1 %v511_v0 }
   0xf   :  { %432 = vmatpush3.bf16.msra.mxu0 %v490_v5  ;;  %452 = vmatpush3.bf16.msra.mxu1 %v498_v10 }
  0x10   :  { %433 = vmatprep.subr.bf16.mxu0 %v511_v0  ;;  %453 = vmatprep.subr.bf16.mxu1 %v511_v0 }
  0x13   :  { %434 = vmatpush3.bf16.msra.mxu0 %v491_v7  ;;  %454 = vmatpush3.bf16.msra.mxu1 %v499_v12 }
  0x14   :  { %435 = vmatprep.subr.bf16.mxu0 %v511_v0  ;;  %455 = vmatprep.subr.bf16.mxu1 %v511_v0 }
  0x17   :  { %436 = vmatpush3.bf16.msra.mxu0 %v492_v9  ;;  %456 = vmatpush3.bf16.msra.mxu1 %v500_v14 }
  0x18   :  { %437 = vmatprep.subr.bf16.mxu0 %v511_v0  ;;  %457 = vmatprep.subr.bf16.mxu1 %v511_v0 }
  0x1b   :  { %438 = vmatpush3.bf16.msra.mxu0 %v493_v11  ;;  %458 = vmatpush3.bf16.msra.mxu1 %v501_v16 }
  0x1c   :  { %439 = vmatprep.subr.bf16.mxu0 %v511_v0  ;;  %459 = vmatprep.subr.bf16.mxu1 %v511_v0 }
  0x1f   :  { %440 = vmatpush3.bf16.msra.mxu0 %v494_v13  ;;  %460 = vmatpush3.bf16.msra.mxu1 %v502_v17 }
  0x20   :  { %465 = vmatprep.subr.bf16.mxu0 %v511_v0 }
  0x22   :  { %442 = vmatmul.mubr.bf16.vlgmr.msra.gmra.mrb[0].mxu0 %v27_v15 }
  0x23   :  { %481 = vmatprep.mubr.msk.bf16.mxu0 %vm512_vm0, %v511_v0  ;;  %466 = vmatpush3.bf16.msra.mxu0 %v503_v18 }
  0x24   :  { %467 = vmatprep.subr.bf16.mxu0 %v511_v0 }
  0x27   :  { %468 = vmatpush3.bf16.msra.mxu0 %v504_v19 }
  0x28   :  { %469 = vmatprep.subr.bf16.mxu0 %v511_v0 }
  0x2b   :  { %470 = vmatpush3.bf16.msra.mxu0 %v505_v20 }
  0x2c   :  { %471 = vmatprep.subr.bf16.mxu0 %v511_v0 }
  0x2f   :  { %472 = vmatpush3.bf16.msra.mxu0 %v506_v21 }
  0x30   :  { %473 = vmatprep.subr.bf16.mxu0 %v511_v0 }
  0x33   :  { %474 = vmatpush3.bf16.msra.mxu0 %v507_v22 }
  0x34   :  { %475 = vmatprep.subr.bf16.mxu0 %v511_v0 }
  0x37   :  { %476 = vmatpush3.bf16.msra.mxu0 %v508_v23 }
  0x38   :  { %477 = vmatprep.subr.bf16.mxu0 %v511_v0 }
  0x3b   :  { %478 = vmatpush3.bf16.msra.mxu0 %v509_v32 }
  0x3c   :  { %479 = vmatprep.subr.bf16.mxu0 %v511_v0 }
  0x3f   :  { %480 = vmatpush3.bf16.msra.mxu0 %v510_v33 }
  0xf5   :  { %v133_v25 = vpop.f32.mrb[0].mxu0 }
  0xf6   :  { %v134_v26 = vadd.f32 %v371_v24, %v133_v25  ;;  %v443_v27 = vpop.f32.mrb[1].mxu0 }
  0xf7   :  { %v136_v28 = vpop.f32.mrb[2].mxu0 }
  0xf8   :  { %v139_v29 = vmax.f32 %v134_v26, 0.0  ;;  %v444_v30 = vpop.f32.mrb[3].mxu0 }
  0xfa   :  { %v140_v31 = vpack.c.bf16 %v139_v29, %v139_v29 }
  0xfc   :  { %462 = vmatmul.mubr.bf16.vlgmr.msra.gmra.mrb[0].mxu1 %v140_v31 }
 0x1cf   :  { %v246_v35 = vpop.f32.mrb[0].mxu1 }
 0x1d0   :  { %v247_v36 = vadd.f32 %v380_v34, %v246_v35  ;;  %v463_v37 = vpop.f32.mrb[1].mxu1 }
 0x1d1   :  { %v249_v38 = vpop.f32.mrb[2].mxu1 }
 0x1d2   :  { %v252_v39 = vmax.f32 %v247_v36, 0.0  ;;  %v464_v40 = vpop.f32.mrb[3].mxu1 }
 0x1d4   :  { %v253_v41 = vpack.c.bf16 %v252_v39, %v252_v39 }
 0x1d6   :  { %482 = vmatmul.mubr.bf16.vlgmr.msra.gmra.mrb[4].mxu0 %v253_v41 }
 0x2a9   :  { %v359_v43 = vpop.f32.mrb[4].mxu0 }
 0x2aa   :  { %v360_v44 = vadd.f32 %v389_v42, %v359_v43  ;;  %v483_v45 = vpop.f32.mrb[5].mxu0 }
 0x2ab   :  { %v362_v46 = vpop.f32.mrb[6].mxu0 }
 0x2ac   :  { %v365_v47 = vmax.f32 %v360_v44, 0.0  ;;  %v484_v48 = vpop.f32.mrb[7].mxu0 }
 0x2ae   :  { %366 = vst [vmem:[%s677_s7] sm:$0xff] %v365_v47 }

</bundles_post_ra>
